<compile_context>
chip_gen: v6e
topology: v6e:2x2x1
jax: 0.10.0
libtpu: 0.0.40
codegen_flags: <defaults>
</compile_context>

<pallas_src>
import functools

import jax
import jax.numpy as jnp
from jax.experimental import pallas as pl
from jax.experimental.pallas import tpu as pltpu


def _layernorm_kernel(alpha_ref, beta_ref, x_ref, o_ref, *, epsilon, inv_d, inv_dm1):
    x = x_ref[...].astype(jnp.float32)                       # (TR, D), accumulate in f32

    mean = jnp.sum(x, axis=-1, keepdims=True) * inv_d        # (TR, 1)
    centered = x - mean                                      # (TR, D)

    # PyTorch x.std(dim=-1) is unbiased (/(D-1)); the module then adds eps and
    # takes *another* sqrt:  denom = sqrt(std + eps)  — quirky, but faithful.
    var = jnp.sum(centered * centered, axis=-1, keepdims=True) * inv_dm1
    denom = jnp.sqrt(jnp.sqrt(var) + epsilon)                # (TR, 1)

    # Fold alpha into a per-row scale: one (TR,1) divide + a single FMA over the slab.
    scale = alpha_ref[0] / denom                             # (TR, 1)
    o_ref[...] = (centered * scale + beta_ref[0]).astype(o_ref.dtype)


def layer_norm_pallas(x, alpha, beta, epsilon=1e-6, tile_rows=None):
    """LayerNorm (quirky PyTorch variant) over the last axis of `x`.

    x: (..., hidden). alpha, beta: shape (1,) scalar parameters.
    """
    orig_shape = x.shape
    hidden = orig_shape[-1]
    rows = 1
    for s in orig_shape[:-1]:
        rows *= s
    x2 = x.reshape(rows, hidden)

    itemsize = x2.dtype.itemsize
    # Sublane alignment: f32 packs 8 rows/vreg, bf16 packs 16, int8 packs 32.
    row_align = 8 * max(1, 4 // itemsize)

    if tile_rows is None:
        # Memory-bound kernel: ~6 MiB HBM tiles (in the input dtype) amortize the
        # ~0.35 us per-grid-step pipeline overhead on v7x's 3.2 TB/s HBM while
        # keeping pipeline buffers + f32 intermediates under v7x's 64 MiB VMEM.
        target_bytes = 6 << 20
        tile_rows = max(row_align, target_bytes // (hidden * itemsize))
        tile_rows = min(tile_rows, 32768)
    tile_rows = max(row_align, (tile_rows // row_align) * row_align)
    # Never make the tile (much) larger than the number of rows.
    tile_rows = min(tile_rows, pl.cdiv(rows, row_align) * row_align)

    # Ragged row edge handled by the pipeline: no padding, no post-slice.
    grid = (pl.cdiv(rows, tile_rows),)

    # VMEM budget: 2 pipeline buffers x (in + out) tiles in the input dtype,
    # plus ~2 f32 tile-sized intermediates (cast + centered), plus slack.
    tile_in_bytes = tile_rows * hidden * itemsize
    tile_f32_bytes = tile_rows * hidden * 4
    vmem_need = 2 * 2 * tile_in_bytes + 2 * tile_f32_bytes + (4 << 20)
    vmem_limit = int(min(max(vmem_need, 32 << 20), 56 << 20))

    inv_d = 1.0 / hidden
    # hidden == 1 → unbiased std is NaN in torch; keep that behavior.
    inv_dm1 = 1.0 / (hidden - 1) if hidden > 1 else float("nan")

    kernel = functools.partial(
        _layernorm_kernel, epsilon=epsilon, inv_d=inv_d, inv_dm1=inv_dm1
    )

    # Advisory estimate with the *real* (unpadded) traffic.
    cost = pl.CostEstimate(
        flops=6 * rows * hidden,
        transcendentals=2 * rows,
        bytes_accessed=2 * rows * hidden * itemsize,
    )

    out = pl.pallas_call(
        kernel,
        out_shape=jax.ShapeDtypeStruct((rows, hidden), x.dtype),
        grid_spec=pltpu.PrefetchScalarGridSpec(
            num_scalar_prefetch=0,
            grid=grid,
            in_specs=[
                pl.BlockSpec(memory_space=pltpu.MemorySpace.SMEM),        # alpha (1,)
                pl.BlockSpec(memory_space=pltpu.MemorySpace.SMEM),        # beta  (1,)
                # Last dim = full unpadded hidden (compiler masks the ragged lane
                # edge); row dim tiled, last partial block masked on store.
                pl.BlockSpec((tile_rows, hidden), lambda i: (i, 0)),
            ],
            out_specs=pl.BlockSpec((tile_rows, hidden), lambda i: (i, 0)),
        ),
        compiler_params=pltpu.CompilerParams(
            dimension_semantics=("parallel",),   # row grid shards across v7x's 2 TCs
            vmem_limit_bytes=vmem_limit,
        ),
        cost_estimate=cost,
    )(alpha, beta, x2)

    return out.reshape(orig_shape)


def layer_norm_reference(x, alpha, beta, epsilon=1e-6):
    mean = jnp.mean(x, axis=-1, keepdims=True)
    centered = x - mean
    var = jnp.sum(centered * centered, axis=-1, keepdims=True) / (x.shape[-1] - 1)
    denom = jnp.sqrt(jnp.sqrt(var) + epsilon)
    return centered / denom * alpha[0] + beta[0]


if __name__ == "__main__":
    key = jax.random.PRNGKey(0)
    # (batch, seq, hidden) — small demo shape; reduction is over the last axis.
    x = jax.random.normal(key, (2, 8, 32), dtype=jnp.float32)

    # Deterministic parameter init, matching nn.Parameter(torch.ones(1)/zeros(1)).
    alpha = jnp.ones((1,), dtype=jnp.float32)
    beta = jnp.zeros((1,), dtype=jnp.float32)

    out = layer_norm_pallas(x, alpha, beta, epsilon=1e-6)
    out = jax.block_until_ready(out)
    ref = layer_norm_reference(x, alpha, beta, epsilon=1e-6)
    assert out.shape == x.shape and out.dtype == x.dtype
    assert jnp.allclose(out, ref, atol=1e-5, rtol=1e-5)

    # Non-default affine params (validates the folded per-row scale).
    alpha2 = jnp.array([1.5], dtype=jnp.float32)
    beta2 = jnp.array([-0.25], dtype=jnp.float32)
    out2 = jax.block_until_ready(layer_norm_pallas(x, alpha2, beta2, epsilon=1e-6))
    ref2 = layer_norm_reference(x, alpha2, beta2, epsilon=1e-6)
    assert jnp.allclose(out2, ref2, atol=1e-5, rtol=1e-5)

    # Ragged row edge: rows (10) not a multiple of tile_rows (8) — exercises the
    # no-padding path where the last block's OOB rows are computed-and-dropped.
    key2 = jax.random.PRNGKey(1)
    x3 = jax.random.normal(key2, (2, 5, 32), dtype=jnp.float32)
    out3 = jax.block_until_ready(
        layer_norm_pallas(x3, alpha2, beta2, epsilon=1e-6, tile_rows=8)
    )
    ref3 = layer_norm_reference(x3, alpha2, beta2, epsilon=1e-6)
    assert jnp.allclose(out3, ref3, atol=1e-5, rtol=1e-5)

    print("KERNEL_OK")
</pallas_src>

<mosaic_0001>
module attributes {stable_mosaic.version = 11 : i64} {
  func.func @_layernorm_kernel(%arg0: i32, %arg1: memref<1xf32, #tpu.memory_space<smem>>, %arg2: memref<1xf32, #tpu.memory_space<smem>>, %arg3: memref<16x32xf32, #tpu.memory_space<vmem>>, %arg4: memref<16x32xf32, #tpu.memory_space<vmem>>) attributes {dimension_semantics = [#tpu.dimension_semantics<parallel>], iteration_bounds = array<i64: 1>, scalar_prefetch = 0 : i64, scratch_operands = 0 : i64, tpu.core_type = #tpu.core_type<tc>, window_params = [{transform_indices = @transform_0, window_bounds = array<i64: 1>}, {transform_indices = @transform_1, window_bounds = array<i64: 1>}, {transform_indices = @transform_2, window_bounds = array<i64: 16, 32>}, {transform_indices = @transform_3, window_bounds = array<i64: 16, 32>}]} {
    %c0 = arith.constant 0 : index
    %c0_0 = arith.constant 0 : index
    %0 = vector.load %arg3[%c0, %c0_0] : memref<16x32xf32, #tpu.memory_space<vmem>>, vector<16x32xf32>
    %cst = arith.constant dense<0.000000e+00> : vector<16xf32>
    %1 = vector.multi_reduction <add>, %0, %cst [1] : vector<16x32xf32> to vector<16xf32>
    %2 = vector.shape_cast %1 : vector<16xf32> to vector<16x1xf32>
    %cst_1 = arith.constant 3.125000e-02 : f32
    %3 = vector.broadcast %cst_1 : f32 to vector<16x1xf32>
    %4 = arith.mulf %2, %3 : vector<16x1xf32>
    %5 = vector.broadcast %4 : vector<16x1xf32> to vector<16x32xf32>
    %6 = arith.subf %0, %5 : vector<16x32xf32>
    %7 = arith.mulf %6, %6 : vector<16x32xf32>
    %cst_2 = arith.constant dense<0.000000e+00> : vector<16xf32>
    %8 = vector.multi_reduction <add>, %7, %cst_2 [1] : vector<16x32xf32> to vector<16xf32>
    %9 = vector.shape_cast %8 : vector<16xf32> to vector<16x1xf32>
    %cst_3 = arith.constant 0.0322580636 : f32
    %10 = vector.broadcast %cst_3 : f32 to vector<16x1xf32>
    %11 = arith.mulf %9, %10 : vector<16x1xf32>
    %12 = math.sqrt %11 : vector<16x1xf32>
    %cst_4 = arith.constant 9.99999997E-7 : f32
    %13 = vector.broadcast %cst_4 : f32 to vector<16x1xf32>
    %14 = arith.addf %12, %13 : vector<16x1xf32>
    %15 = math.sqrt %14 : vector<16x1xf32>
    %c0_5 = arith.constant 0 : index
    %16 = memref.load %arg1[%c0_5] : memref<1xf32, #tpu.memory_space<smem>>
    %17 = vector.broadcast %16 : f32 to vector<16x1xf32>
    %18 = arith.divf %17, %15 : vector<16x1xf32>
    %19 = vector.broadcast %18 : vector<16x1xf32> to vector<16x32xf32>
    %20 = arith.mulf %6, %19 : vector<16x32xf32>
    %c0_6 = arith.constant 0 : index
    %21 = memref.load %arg2[%c0_6] : memref<1xf32, #tpu.memory_space<smem>>
    %22 = vector.broadcast %21 : f32 to vector<16x32xf32>
    %23 = arith.addf %20, %22 : vector<16x32xf32>
    %c0_7 = arith.constant 0 : index
    %c0_8 = arith.constant 0 : index
    %24 = vector.load %arg4[%c0_7, %c0_8] : memref<16x32xf32, #tpu.memory_space<vmem>>, vector<16x32xf32>
    tpu.vector_store %arg4[%c0_7, %c0_8], %23 {strides = array<i32>} : memref<16x32xf32, #tpu.memory_space<vmem>>, vector<16x32xf32>,
    return
  }
  func.func @transform_0(%arg0: i32) -> i32 {
    %c0_i32 = arith.constant 0 : i32
    %c0_i32_0 = arith.constant 0 : i32
    return %c0_i32 : i32
  }
  func.func @transform_1(%arg0: i32) -> i32 {
    %c0_i32 = arith.constant 0 : i32
    %c0_i32_0 = arith.constant 0 : i32
    return %c0_i32 : i32
  }
  func.func @transform_2(%arg0: i32) -> (i32, i32) {
    %c0_i32 = arith.constant 0 : i32
    %c0_i32_0 = arith.constant 0 : i32
    return %arg0, %c0_i32 : i32, i32
  }
  func.func @transform_3(%arg0: i32) -> (i32, i32) {
    %c0_i32 = arith.constant 0 : i32
    %c0_i32_0 = arith.constant 0 : i32
    return %arg0, %c0_i32 : i32, i32
  }
}

</mosaic_0001>

<bundles_post_ra>
// kernel: tpu_custom_call.1
= control target key start
LH: loop header
LB: loop body
LE: loop exit
PB: predicated region body
PF: predicated region fallthrough
CT: control target
= control target key end

     0   :  { %10 = vsyncpa [#allocation5], 0  ;;  %s223_s0 = inlined_call_operand.<no memory space> [shape: f32[1], index: 0, kind: input, shape index: {}]   ;;  %s224_s1 = inlined_call_operand.<no memory space> [shape: f32[1], index: 1, kind: input, shape index: {}]   ;;  %s225_s2 = inlined_call_operand.hbm [shape: f32[16,32], index: 2, kind: input, shape index: {}]   ;;  %s226_s3 = inlined_call_operand.hbm [shape: f32[16,32], index: 3, kind: output, shape index: {}]  }
   0x1   :  { %11 = vsyncpa [#allocation6], 0  ;;  %s175_s12 = smov [#allocation4]  }
   0x2   :  { %s21_s13 = sshll.u32 %s175_s12, 4  ;;  %s22_s13 = int_to_ptr.vmem [resolvable:$true] %s21_s13 }
   0x3   :  { %s139_s14 = scalar_lea.vmem %s22_s13, 256  ;;  %p144_p1 = scmp.lt.s32.totalorder %s22_s13, %s22_s13 }
   0x4   :  { %p140_p0 = scmp.ne.s32.totalorder %s22_s13, %s139_s14  ;;  %p145_p2 = scmp.lt.s32.totalorder %s139_s14, %s139_s14 }
   0x6   :  { %p146_p3 = por %p145_p2, %p144_p1 }
   0x8   :  { %p147_p4 = pnand %p146_p3, %p140_p0 }
   0xa   :  { %150 = shalt.err (!%p147_p4)
}
   0xb   :  { %s176_s15 = smov 128   ;;  %s177_s16 = smov 8  }
   0xc   :  { %27 = dma.hbm_to_vmem [thread:$0]  %s225_s2, 256, %s22_s13, [#allocation5], %s176_s15, %s176_s15, %s177_s16  }
   0xd   :  { %171 = dma.done.wait [#allocation5], 256  }
   0xe   :  { %172 = vsyncadd [#allocation5], 4294967040  ;;  %vm33_vm0 = vcmask 261120   ;;  %v31_v0 = vld [vmem:[#allocation4] sm:$0xff]  ;;  %v32_v1 = vld [vmem:[#allocation4 + $0x8] sm:$0xff]  ;;  %v85_v40 = vstv %s223_s0  ;;  %v93_v43 = vstv %s224_s1  ;;  %s178_s22 = smov [#allocation7]  }
   0xf   :  { %v34_v2 = vsel %vm33_vm0, %v31_v0, 0.0  ;;  %v37_v3 = vsel %vm33_vm0, %v32_v1, 0.0  ;;  %s103_s23 = sshll.u32 %s178_s22, 4  ;;  %s104_s23 = int_to_ptr.vmem [resolvable:$true] %s103_s23 }
  0x10   :  { %35 = vadd.xlane.f32.xlu0 %v34_v2  ;;  %s151_s0 = scalar_lea.vmem %s104_s23, 256  ;;  %p156_p6 = scmp.lt.s32.totalorder %s104_s23, %s104_s23 }
  0x11   :  { %p152_p5 = scmp.ne.s32.totalorder %s104_s23, %s151_s0  ;;  %p157_p7 = scmp.lt.s32.totalorder %s151_s0, %s151_s0 }
  0x13   :  { %p158_p8 = por %p157_p7, %p156_p6 }
  0x14   :  { %38 = vadd.xlane.f32.xlu0 %v37_v3 }
  0x15   :  { %p159_p9 = pnand %p158_p8, %p152_p5 }
  0x99   :  { %v36_v4 = vpop.xlane.xlu0 %35 }
  0x9a   :  { %v40_v5 = vmul.f32 0.03125, %v36_v4 }
  0x9c   :  { %v42_v6 = vsub.f32 %v31_v0, %v40_v5 }
  0x9d   :  { %v39_v7 = vpop.xlane.xlu0 %38 }
  0x9e   :  { %v41_v8 = vmul.f32 0.03125, %v39_v7  ;;  %v44_v9 = vmul.f32 %v42_v6, %v42_v6 }
  0xa0   :  { %v43_v10 = vsub.f32 %v32_v1, %v41_v8  ;;  %v46_v11 = vsel %vm33_vm0, %v44_v9, 0.0 }
  0xa1   :  { %47 = vadd.xlane.f32.xlu1 %v46_v11 }
  0xa2   :  { %v45_v12 = vmul.f32 %v43_v10, %v43_v10 }
  0xa4   :  { %v49_v13 = vsel %vm33_vm0, %v45_v12, 0.0 }
  0xa5   :  { %50 = vadd.xlane.f32.xlu1 %v49_v13 }
 0x12a   :  { %v48_v14 = vpop.xlane.xlu1 %47 }
 0x12b   :  { %v52_v15 = vmul.f32 0.032258064, %v48_v14 }
 0x12d   :  { %119 = vrsqrt.f32 %v52_v15  ;;  %vm56_vm1 = vcmp.eq.f32.partialorder %v52_v15, inf  ;;  %v59_v20 = vand.u32 2147483648, %v52_v15  ;;  %vm58_vm2 = vcmp.eq.f32.partialorder %v52_v15, 0.0 }
 0x12e   :  { %v51_v16 = vpop.xlane.xlu1 %50 }
 0x12f   :  { %v53_v17 = vmul.f32 0.032258064, %v51_v16 }
 0x131   :  { %121 = vrsqrt.f32 %v53_v17  ;;  %vm63_vm3 = vcmp.eq.f32.partialorder %v53_v17, inf  ;;  %v66_v26 = vand.u32 2147483648, %v53_v17  ;;  %vm65_vm4 = vcmp.eq.f32.partialorder %v53_v17, 0.0 }
 0x13a   :  { %v120_v18 = vpop.eup %119 }
 0x13b   :  { %v55_v19 = vmul.f32 %v120_v18, %v52_v15 }
 0x13d   :  { %v57_v21 = vsel %vm56_vm1, %v52_v15, %v55_v19 }
 0x13e   :  { %v122_v22 = vpop.eup %121  ;;  %v60_v23 = vsel %vm58_vm2, %v59_v20, %v57_v21 }
 0x13f   :  { %v68_v24 = vadd.f32 1e-06, %v60_v23  ;;  %v62_v25 = vmul.f32 %v122_v22, %v53_v17 }
 0x141   :  { %123 = vrsqrt.f32 %v68_v24  ;;  %v64_v27 = vsel %vm63_vm3, %v53_v17, %v62_v25  ;;  %vm72_vm5 = vcmp.eq.f32.partialorder %v68_v24, inf  ;;  %v75_v32 = vand.u32 2147483648, %v68_v24 }
 0x142   :  { %v67_v28 = vsel %vm65_vm4, %v66_v26, %v64_v27  ;;  %vm74_vm6 = vcmp.eq.f32.partialorder %v68_v24, 0.0 }
 0x143   :  { %v69_v29 = vadd.f32 1e-06, %v67_v28 }
 0x145   :  { %125 = vrsqrt.f32 %v69_v29  ;;  %vm79_vm7 = vcmp.eq.f32.partialorder %v69_v29, inf  ;;  %v82_v37 = vand.u32 2147483648, %v69_v29  ;;  %vm81_vm8 = vcmp.eq.f32.partialorder %v69_v29, 0.0 }
 0x14e   :  { %v124_v30 = vpop.eup %123 }
 0x14f   :  { %v71_v31 = vmul.f32 %v124_v30, %v68_v24 }
 0x151   :  { %v73_v33 = vsel %vm72_vm5, %v68_v24, %v71_v31 }
 0x152   :  { %v126_v34 = vpop.eup %125  ;;  %v76_v35 = vsel %vm74_vm6, %v75_v32, %v73_v33 }
 0x153   :  { %v78_v36 = vmul.f32 %v126_v34, %v69_v29  ;;  %127 = vrcp.f32 %v76_v35 }
 0x155   :  { %v80_v38 = vsel %vm79_vm7, %v69_v29, %v78_v36 }
 0x156   :  { %v83_v39 = vsel %vm81_vm8, %v82_v37, %v80_v38 }
 0x157   :  { %129 = vrcp.f32 %v83_v39 }
 0x160   :  { %v128_v41 = vpop.eup %127 }
 0x161   :  { %v87_v42 = vmul.f32 %v128_v41, %v85_v40 }
 0x163   :  { %v90_v44 = vmul.f32 %v87_v42, %v42_v6 }
 0x164   :  { %v130_v45 = vpop.eup %129 }
 0x165   :  { %v89_v46 = vmul.f32 %v130_v45, %v85_v40  ;;  %v94_v47 = vadd.f32 %v93_v43, %v90_v44 }
 0x167   :  { %v91_v48 = vmul.f32 %v89_v46, %v43_v10  ;;  %96 = vst.msk [vmem:[#allocation7] sm:$0xff] %vm33_vm0, %v94_v47 }
 0x169   :  { %v95_v49 = vadd.f32 %v93_v43, %v91_v48 }
 0x16b   :  { %97 = vst.msk [vmem:[#allocation7 + $0x8] sm:$0xff] %vm33_vm0, %v95_v49 }
 0x16c   :  { %162 = shalt.err (!%p159_p9)
}
 0x16d   :  { %109 = dma.vmem_to_hbm [thread:$0]  %s104_s23, 256, %s226_s3, [#allocation6], %s176_s15, %s176_s15, %s177_s16  }
 0x16e   :  { %173 = dma.done.wait [#allocation6], 256  }
 0x16f   :  { %174 = vsyncadd [#allocation6], 4294967040 }
 0x170   :  { %113 = vsyncpa [#allocation5], 1 }
 0x171   :  { %114 = vsyncpa [#allocation6], 1 }

</bundles_post_ra>
